<compile_context>
chip_gen: v5e
topology: v5e:2x2
jax: 0.10.0
libtpu: 0.0.40
codegen_flags: <defaults>
</compile_context>

<pallas_src>
import jax
import jax.numpy as jnp
from jax.experimental import pallas as pl
from jax.experimental.pallas import tpu as pltpu


def _place_token_kernel(params_ref, x_ref, o_ref):
    """params_ref: SMEM int32[2] = (insert_ix, token).
       x_ref: (TB, S) input tile.  o_ref: (TB, S+1) output tile.

       out[:, j] = x[:, j]    if j <  insert_ix
                 = token      if j == insert_ix
                 = x[:, j-1]  if j >  insert_ix
    """
    ins = params_ref[0]
    tok = params_ref[1]

    x = x_ref[...]                                            # (TB, S)
    tb, s = x.shape

    # Build the padded view in VMEM (one extra zero lane column) and its
    # right-shifted copy.  The roll wraparound lands at column 0, which is only
    # consumed when insert_ix == 0 — where the token branch wins — so it is
    # harmless.  Roll/iota/selects run on XLU/VPU slots that are pure filler
    # under the DMA; the kernel is HBM-bound.
    xp = jnp.concatenate([x, jnp.zeros((tb, 1), x.dtype)], axis=1)   # (TB, S+1)
    shifted = pltpu.roll(xp, shift=1, axis=1)                        # xp[:, j-1]
    col = jax.lax.broadcasted_iota(jnp.int32, xp.shape, dimension=1)

    o_ref[...] = jnp.where(col < ins, xp,
                           jnp.where(col == ins, tok, shifted))


def _choose_block_rows(B: int, S: int) -> int:
    """Rows per block: ~2 MiB per buffer (int32), multiple of 8, capped at B."""
    target_rows = max(8, (2 * 1024 * 1024) // (4 * (S + 1)))
    if B <= target_rows:
        return B                      # single block along batch (== full dim)
    return min(B, (target_rows // 8) * 8)


@jax.jit
def _place_token_call(batch: jax.Array, params: jax.Array) -> jax.Array:
    """batch: int32 [B, S]; params: int32 [2] = (insert_ix, token) -> int32 [B, S+1]."""
    B, S = batch.shape
    tb = _choose_block_rows(B, S)
    grid = (pl.cdiv(B, tb),)

    grid_spec = pltpu.PrefetchScalarGridSpec(
        num_scalar_prefetch=1,                 # params -> SMEM, passed to index_maps
        grid=grid,
        in_specs=[pl.BlockSpec((tb, S), lambda i, p: (i, 0))],
        out_specs=pl.BlockSpec((tb, S + 1), lambda i, p: (i, 0)),
    )
    return pl.pallas_call(
        _place_token_kernel,
        out_shape=jax.ShapeDtypeStruct((B, S + 1), jnp.int32),
        grid_spec=grid_spec,
        compiler_params=pltpu.CompilerParams(
            dimension_semantics=("parallel",),   # shard batch across TCs (v7x)
        ),
    )(params, batch)


def place_token(batch: jax.Array, token_ix: int, position: int) -> jax.Array:
    """int32 [B, S] -> int32 [B, S+1], token_ix inserted at `position` in every row."""
    batch = batch.astype(jnp.int32)
    B, S = batch.shape
    # Same index rule as the PyTorch module, then python list.insert clamping
    # (negative indices count from the end, everything clamped to [0, S]).
    ix = position if position >= 0 else S + position + 1
    if ix < 0:
        ix = S + ix
    ix = max(0, min(ix, S))
    params = jnp.array([ix, token_ix], dtype=jnp.int32)
    return _place_token_call(batch, params)


def _reference(batch, token_ix, position):
    """Pure-python reference mirroring the PyTorch module (list.insert)."""
    out = []
    for row in batch.tolist():
        row = list(row)
        ix = position if position >= 0 else len(row) + position + 1
        row.insert(ix, token_ix)
        out.append(row)
    return jnp.asarray(out, dtype=jnp.int32)


if __name__ == "__main__":
    # TODO(synk): the PyTorch module accepts ragged python lists; the kernel
    # assumes a dense equal-length int32 [B, S] batch.
    key = jax.random.PRNGKey(0)
    B, S = 2, 8
    vocab = 100
    token_ix = 101
    batch = jax.random.randint(key, (B, S), minval=0, maxval=vocab, dtype=jnp.int32)

    ok = True
    # front, middle, append (-1), explicit append (S), and far-negative edge cases
    for position in (0, 2, -1, S, -(S + 1), -(S + 2), -100):
        out = jax.block_until_ready(place_token(batch, token_ix, position))
        ref = _reference(batch, token_ix, position)
        if out.shape != ref.shape or not bool(jnp.all(out == ref)):
            ok = False
            print(f"MISMATCH at position={position}\n got={out}\n ref={ref}")

    if ok:
        print("KERNEL_OK")
</pallas_src>

<mosaic_0001>
module attributes {stable_mosaic.version = 11 : i64} {
  func.func @_place_token_kernel(%arg0: i32, %arg1: memref<2xi32, #tpu.memory_space<smem>>, %arg2: memref<2x8xi32, #tpu.memory_space<vmem>>, %arg3: memref<2x9xi32, #tpu.memory_space<vmem>>) attributes {dimension_semantics = [#tpu.dimension_semantics<parallel>], iteration_bounds = array<i64: 1>, scalar_prefetch = 1 : i64, scratch_operands = 0 : i64, tpu.core_type = #tpu.core_type<tc>, window_params = [{transform_indices = @transform_0, window_bounds = array<i64: 2, 8>}, {transform_indices = @transform_1, window_bounds = array<i64: 2, 9>}]} {
    %c0 = arith.constant 0 : index
    %0 = memref.load %arg1[%c0] : memref<2xi32, #tpu.memory_space<smem>>
    %c1 = arith.constant 1 : index
    %1 = memref.load %arg1[%c1] : memref<2xi32, #tpu.memory_space<smem>>
    %c0_0 = arith.constant 0 : index
    %c0_1 = arith.constant 0 : index
    %2 = vector.load %arg2[%c0_0, %c0_1] : memref<2x8xi32, #tpu.memory_space<vmem>>, vector<2x8xi32>
    %c0_i32 = arith.constant 0 : i32
    %3 = vector.broadcast %c0_i32 : i32 to vector<2x1xi32>
    %4 = tpu.concatenate %2, %3 in 1 : vector<2x8xi32>, vector<2x1xi32> -> vector<2x9xi32>
    %c1_i32 = arith.constant 1 : i32
    %5 = tpu.dynamic_rotate %4 by %c1_i32 dim 1 : vector<2x9xi32>, i32 -> vector<2x9xi32>
    %6 = tpu.iota {dimensions = array<i32: 1>} : vector<2x9xi32>
    %7 = vector.broadcast %0 : i32 to vector<2x9xi32>
    %8 = arith.cmpi slt, %6, %7 : vector<2x9xi32>
    %9 = vector.broadcast %0 : i32 to vector<2x9xi32>
    %10 = arith.cmpi eq, %6, %9 : vector<2x9xi32>
    %11 = vector.broadcast %1 : i32 to vector<2x9xi32>
    %12 = arith.select %10, %11, %5 : vector<2x9xi1>, vector<2x9xi32>
    %13 = arith.select %8, %4, %12 : vector<2x9xi1>, vector<2x9xi32>
    %c0_2 = arith.constant 0 : index
    %c0_3 = arith.constant 0 : index
    %14 = vector.load %arg3[%c0_2, %c0_3] : memref<2x9xi32, #tpu.memory_space<vmem>>, vector<2x9xi32>
    tpu.vector_store %arg3[%c0_2, %c0_3], %13 {strides = array<i32>} : memref<2x9xi32, #tpu.memory_space<vmem>>, vector<2x9xi32>,
    return
  }
  func.func @transform_0(%arg0: i32, %arg1: memref<2xi32, #tpu.memory_space<smem>>) -> (i32, i32) {
    %c0_i32 = arith.constant 0 : i32
    %c0_i32_0 = arith.constant 0 : i32
    return %arg0, %c0_i32 : i32, i32
  }
  func.func @transform_1(%arg0: i32, %arg1: memref<2xi32, #tpu.memory_space<smem>>) -> (i32, i32) {
    %c0_i32 = arith.constant 0 : i32
    %c0_i32_0 = arith.constant 0 : i32
    return %arg0, %c0_i32 : i32, i32
  }
}

</mosaic_0001>

<bundles_post_ra>
// kernel: _place_token_call.1
= control target key start
LH: loop header
LB: loop body
LE: loop exit
PB: predicated region body
PF: predicated region fallthrough
CT: control target
= control target key end

     0   :  { %s145_s12 = smov [#allocation3]   ;;  %s174_s0 = inlined_call_operand.hbm [shape: s32[2], index: 0, kind: input, shape index: {}]   ;;  %s175_s1 = inlined_call_operand.hbm [shape: s32[2,8], index: 1, kind: input, shape index: {}]   ;;  %s176_s2 = inlined_call_operand.hbm [shape: s32[2,9], index: 2, kind: output, shape index: {}]  }
   0x1   :  { %s8_s11 = sshll.u32 %s174_s0, 4  ;;  %s9_s11 = int_to_ptr.hbm [resolvable:$true] %s8_s11 }
   0x2   :  { %11 = dma.hbm_to_smem %s9_s11, 16, %s145_s12, [#allocation2] }
   0x3   :  { %139 = dma.done.wait [#allocation2], 16 }
   0x4   :  { %140 = vsyncadd [#allocation2], 4294967280 }
   0x5   :  { %14 = sfence }
   0x6   :  { %15 = vsyncpa [#allocation5], 0 }
   0x7   :  { %16 = vsyncpa [#allocation6], 0  ;;  %s22_s15 = sshll.u32 %s175_s1, 4  ;;  %s146_s16 = smov [#allocation4]   ;;  %s23_s15 = int_to_ptr.hbm [resolvable:$true] %s22_s15 }
   0x8   :  { %s24_s17 = sshll.u32 %s146_s16, 4  ;;  %s25_s17 = int_to_ptr.vmem [resolvable:$true] %s24_s17 }
   0x9   :  { %27 = dma.hbm_to_vmem [thread:$0]  %s23_s15, 32, %s25_s17, [#allocation5]  }
   0xa   :  { %141 = dma.done.wait [#allocation5], 32  }
   0xb   :  { %142 = vsyncadd [#allocation5], 4294967264  ;;  %vm35_vm0 = vcmask 64512   ;;  %v34_v0 = vld [vmem:[#allocation4] sm:$0x3]  ;;  %s147_s0 = smov 9   ;;  %v44_v6 = vlaneseq }
   0xc   :  { %v36_v1 = vsel %vm35_vm0, %v34_v0, 0  ;;  %vm37_vm1 = vcmask 1047624   ;;  %s148_s18 = smov 120   ;;  %s32_s1 = sld [smem:[#allocation3]]  ;;  %vm54_vm4 = vcmask 66560  }
   0xd   :  { %38 = vrot.lane.b32.xlu0 %v36_v1, %s147_s0  ;;  %s73_s19 = sld [smem:[#allocation3 + $0x1]]  ;;  %v45_v7 = vand.u32 127, %v44_v6  ;;  %s149_s20 = smov [#allocation7]  }
   0xe   :  { %s61_s21 = sshll.u32 %s149_s20, 4  ;;  %s63_s24 = sshll.u32 %s176_s2, 4  ;;  %s62_s21 = int_to_ptr.vmem [resolvable:$true] %s61_s21  ;;  %s64_s24 = int_to_ptr.hbm [resolvable:$true] %s63_s24 }
  0x12   :  { %v46_v8 = vstv %s32_s1 }
  0x13   :  { %vm48_vm2 = vcmp.eq.s32.totalorder %v45_v7, %v46_v8  ;;  %v49_v9 = vstv %s73_s19  ;;  %vm47_vm3 = vcmp.lt.s32.totalorder %v45_v7, %v46_v8 }
  0x7f   :  { %v39_v2 = vpop.permute.xlu0 %38 }
  0x80   :  { %v40_v3 = vsel %vm37_vm1, %v39_v2, %v36_v1 }
  0x81   :  { %41 = vrot.lane.b32.xlu0 %v40_v3, %s147_s0 }
  0xf3   :  { %v42_v4 = vpop.permute.xlu0 %41 }
  0xf4   :  { %v43_v5 = vsel %vm37_vm1, %v42_v4, %v36_v1 }
  0xf5   :  { %50 = vrot.lane.b32.xlu1 %v43_v5, %s148_s18 }
 0x167   :  { %v51_v10 = vpop.permute.xlu1 %50 }
 0x168   :  { %v52_v11 = vsel %vm48_vm2, %v49_v9, %v51_v10 }
 0x169   :  { %v53_v12 = vsel %vm47_vm3, %v36_v1, %v52_v11 }
 0x16a   :  { %55 = vst.msk [vmem:[#allocation7] sm:$0x3] %vm54_vm4, %v53_v12 }
 0x16b   :  { %66 = dma.vmem_to_hbm [thread:$0]  %s62_s21, 32, %s64_s24, [#allocation6]  }
 0x16c   :  { %143 = dma.done.wait [#allocation6], 32  }
 0x16d   :  { %144 = vsyncadd [#allocation6], 4294967264 }
 0x16e   :  { %71 = vsyncpa [#allocation5], 1 }
 0x16f   :  { %72 = vsyncpa [#allocation6], 1 }

</bundles_post_ra>
